<compile_context>
chip_gen: v7x
topology: tpu7x:2x2x1
jax: 0.10.0
libtpu: 0.0.40
codegen_flags: <defaults>
</compile_context>

<pallas_src>
import functools

import jax
import jax.numpy as jnp
from jax.experimental import pallas as pl
from jax.experimental.pallas import tpu as pltpu


def _pad_to(n: int, m: int) -> int:
    return ((n + m - 1) // m) * m


def _fused_chebkan_kernel(x_ref, *refs, num_layers: int, degree: int):
    """Fused forward over all ChebyKAN layers.

    x_ref : (TB, in_pad0) f32 activation tile in VMEM.
    refs  : [W_0, b_0, W_1, b_1, ..., W_{L-1}, b_{L-1}, o_ref]
            W_l : (degree * in_pad_l, out_pad_l) f32  (lane-aligned 2D weights)
            b_l : (1, out_pad_l) f32                  (folded T_0 term)
    o_ref : (TB, out_pad_last) f32 output tile.
    """
    o_ref = refs[-1]
    params = refs[:-1]

    act = x_ref[...].astype(jnp.float32)  # (TB, in_pad)

    for l in range(num_layers):
        w_ref = params[2 * l]
        b_ref = params[2 * l + 1]

        t = jnp.tanh(act)  # (TB, in_pad)

        if degree >= 1:
            # Chebyshev basis T_1..T_deg (T_0 folded into bias).
            basis = [t]
            t_prev2 = jnp.ones_like(t)
            t_prev1 = t
            for _d in range(2, degree + 1):
                t_cur = 2.0 * t * t_prev1 - t_prev2
                basis.append(t_cur)
                t_prev2, t_prev1 = t_prev1, t_cur
            if len(basis) > 1:
                big_t = jnp.concatenate(basis, axis=-1)  # (TB, deg*in_pad)
            else:
                big_t = basis[0]
            act = (
                jnp.dot(big_t, w_ref[...], preferred_element_type=jnp.float32)
                + b_ref[...]
            )
        else:
            # degree == 0: output is just the folded T_0 bias.
            act = jnp.broadcast_to(b_ref[...], (act.shape[0], b_ref.shape[-1]))

    o_ref[...] = act.astype(o_ref.dtype)


def cheb_kan_fused_forward(x_padded, weights, biases, *, degree: int, tb: int):
    """One fused pallas_call over all layers, tiled over the (padded) batch."""
    b_pad, in_pad0 = x_padded.shape
    num_layers = len(weights)
    out_pad_last = biases[-1].shape[-1]
    assert b_pad % tb == 0

    in_specs = [pl.BlockSpec((tb, in_pad0), lambda i: (i, 0))]
    args = [x_padded]
    for w, b in zip(weights, biases):
        # Coefficients: same (full) block at every grid step -> stay VMEM-resident.
        in_specs.append(pl.BlockSpec(w.shape, lambda i: (0, 0)))
        in_specs.append(pl.BlockSpec(b.shape, lambda i: (0, 0)))
        args.append(w)
        args.append(b)

    out_spec = pl.BlockSpec((tb, out_pad_last), lambda i: (i, 0))

    kernel = functools.partial(
        _fused_chebkan_kernel, num_layers=num_layers, degree=degree
    )

    return pl.pallas_call(
        kernel,
        out_shape=jax.ShapeDtypeStruct((b_pad, out_pad_last), jnp.float32),
        grid=(b_pad // tb,),
        in_specs=in_specs,
        out_specs=out_spec,
        compiler_params=pltpu.CompilerParams(
            dimension_semantics=("parallel",),  # v7x: shard batch tiles across 2 TCs
        ),
    )(*args)


class ChebKANNetworkPallas:
    """JAX/Pallas counterpart of ChebKAN_Network (forward pass only)."""

    LANE = 128  # pad every feature width to a multiple of the lane width

    def __init__(self, layer_widths, degree, VS=1.0, Diff_param=1.0, key=None):
        self.layer_widths = list(layer_widths)
        self.degree = int(degree)
        self.VS = VS
        self.Diff_param = Diff_param
        if key is None:
            key = jax.random.PRNGKey(0)

        # Original coefficients (for the pure-JAX reference) stored as
        # (degree+1, in_dim, out_dim)  ==  PyTorch cheby_coeffs.transpose(2, 0, 1).
        self.coeffs = []
        # Kernel-ready, lane-aligned parameters.
        self.weights = []   # (degree * in_pad, out_pad) f32
        self.biases = []    # (1, out_pad) f32  (folded T_0 term)
        self.in_pads = []
        self.out_pads = []

        for i in range(len(layer_widths) - 1):
            in_dim = layer_widths[i]
            out_dim = layer_widths[i + 1]
            key, sub = jax.random.split(key)
            std = 1.0 / (in_dim * (self.degree + 1))
            c = std * jax.random.normal(
                sub, (self.degree + 1, in_dim, out_dim), dtype=jnp.float32
            )
            self.coeffs.append(c)

            in_pad = _pad_to(in_dim, self.LANE)
            out_pad = _pad_to(out_dim, self.LANE)
            self.in_pads.append(in_pad)
            self.out_pads.append(out_pad)

            # W[(d-1)*in_pad + i, o] = coeff[d, i, o] for d=1..degree; zeros in padding.
            if self.degree >= 1:
                w = jnp.zeros((self.degree, in_pad, out_pad), dtype=jnp.float32)
                w = w.at[:, :in_dim, :out_dim].set(c[1:])
                w = w.reshape(self.degree * in_pad, out_pad)
            else:
                w = jnp.zeros((1, out_pad), dtype=jnp.float32)  # unused placeholder
            # bias[o] = sum_i coeff[0, i, o]   (the T_0 == 1 contribution)
            b = jnp.zeros((1, out_pad), dtype=jnp.float32)
            b = b.at[0, :out_dim].set(jnp.sum(c[0], axis=0))

            self.weights.append(w)
            self.biases.append(b)

    def forward(self, x):
        x = jnp.asarray(x, dtype=jnp.float32)
        B, in_dim = x.shape
        assert in_dim == self.layer_widths[0]

        in_pad0 = self.in_pads[0]
        out_dim_last = self.layer_widths[-1]

        # Batch tiling: modest tiles pipeline well; pad B to a multiple of the tile.
        tb = min(512, _pad_to(B, 8))
        b_pad = _pad_to(B, tb)

        x_p = jnp.zeros((b_pad, in_pad0), dtype=jnp.float32)
        x_p = x_p.at[:B, :in_dim].set(x)

        out_p = cheb_kan_fused_forward(
            x_p, self.weights, self.biases, degree=self.degree, tb=tb
        )
        out = out_p[:B, :out_dim_last]
        return out, x  # matches PyTorch forward's (out, x)


def _reference_forward(x, coeffs, degree):
    """Pure-JAX reference (unpadded) for validation."""
    out = x
    for c in coeffs:
        t = jnp.tanh(out)
        basis = [jnp.ones_like(t)]
        if degree >= 1:
            basis.append(t)
        for _d in range(2, degree + 1):
            basis.append(2.0 * t * basis[-1] - basis[-2])
        basis = jnp.stack(basis, axis=0)  # (deg+1, B, in)
        out = jnp.einsum("dbi,dio->bo", basis, c)
    return out


if __name__ == "__main__":
    # Small PDE-style configuration: input (x, t) -> hidden -> hidden -> u
    layer_widths = [2, 32, 32, 1]
    degree = 3
    batch = 16

    key = jax.random.PRNGKey(0)
    key_net, key_x = jax.random.split(key)

    net = ChebKANNetworkPallas(
        layer_widths, degree, VS=1.0, Diff_param=1.0, key=key_net
    )

    X = jax.random.uniform(
        key_x, (batch, layer_widths[0]), dtype=jnp.float32, minval=-1.0, maxval=1.0
    )

    U, X_out = net.forward(X)
    U = jax.block_until_ready(U)
    X_out = jax.block_until_ready(X_out)

    # Numerical check against the plain-JAX reference.
    U_ref = _reference_forward(X, net.coeffs, degree)
    assert U.shape == (batch, layer_widths[-1])
    assert X_out.shape == X.shape
    assert jnp.allclose(U, U_ref, atol=1e-5, rtol=1e-5), "Pallas output mismatch"

    print("KERNEL_OK")
</pallas_src>

<mosaic_0001>
module attributes {stable_mosaic.version = 11 : i64} {
  func.func @_fused_chebkan_kernel(%arg0: i32, %arg1: memref<16x128xf32, #tpu.memory_space<vmem>>, %arg2: memref<384x128xf32, #tpu.memory_space<vmem>>, %arg3: memref<1x128xf32, #tpu.memory_space<vmem>>, %arg4: memref<384x128xf32, #tpu.memory_space<vmem>>, %arg5: memref<1x128xf32, #tpu.memory_space<vmem>>, %arg6: memref<384x128xf32, #tpu.memory_space<vmem>>, %arg7: memref<1x128xf32, #tpu.memory_space<vmem>>, %arg8: memref<16x128xf32, #tpu.memory_space<vmem>>) attributes {dimension_semantics = [#tpu.dimension_semantics<parallel>], iteration_bounds = array<i64: 1>, scalar_prefetch = 0 : i64, scratch_operands = 0 : i64, tpu.core_type = #tpu.core_type<tc>, window_params = [{transform_indices = @transform_0, window_bounds = array<i64: 16, 128>}, {pipeline_mode = #tpu.pipeline_mode<synchronous>, transform_indices = @transform_1, window_bounds = array<i64: 384, 128>}, {pipeline_mode = #tpu.pipeline_mode<synchronous>, transform_indices = @transform_2, window_bounds = array<i64: 1, 128>}, {pipeline_mode = #tpu.pipeline_mode<synchronous>, transform_indices = @transform_3, window_bounds = array<i64: 384, 128>}, {pipeline_mode = #tpu.pipeline_mode<synchronous>, transform_indices = @transform_4, window_bounds = array<i64: 1, 128>}, {pipeline_mode = #tpu.pipeline_mode<synchronous>, transform_indices = @transform_5, window_bounds = array<i64: 384, 128>}, {pipeline_mode = #tpu.pipeline_mode<synchronous>, transform_indices = @transform_6, window_bounds = array<i64: 1, 128>}, {transform_indices = @transform_7, window_bounds = array<i64: 16, 128>}]} {
    %c0 = arith.constant 0 : index
    %c0_0 = arith.constant 0 : index
    %0 = vector.load %arg1[%c0, %c0_0] : memref<16x128xf32, #tpu.memory_space<vmem>>, vector<16x128xf32>
    %1 = math.tanh %0 : vector<16x128xf32>
    %cst = arith.constant 1.000000e+00 : f32
    %2 = vector.broadcast %cst : f32 to vector<16x128xf32>
    %cst_1 = arith.constant 2.000000e+00 : f32
    %3 = vector.broadcast %cst_1 : f32 to vector<16x128xf32>
    %4 = arith.mulf %3, %1 : vector<16x128xf32>
    %5 = arith.mulf %4, %1 : vector<16x128xf32>
    %6 = arith.subf %5, %2 : vector<16x128xf32>
    %cst_2 = arith.constant 2.000000e+00 : f32
    %7 = vector.broadcast %cst_2 : f32 to vector<16x128xf32>
    %8 = arith.mulf %7, %1 : vector<16x128xf32>
    %9 = arith.mulf %8, %6 : vector<16x128xf32>
    %10 = arith.subf %9, %1 : vector<16x128xf32>
    %11 = tpu.concatenate %1, %6, %10 in 1 : vector<16x128xf32>, vector<16x128xf32>, vector<16x128xf32> -> vector<16x384xf32>
    %c0_3 = arith.constant 0 : index
    %c0_4 = arith.constant 0 : index
    %12 = vector.load %arg2[%c0_3, %c0_4] : memref<384x128xf32, #tpu.memory_space<vmem>>, vector<384x128xf32>
    %cst_5 = arith.constant dense<0.000000e+00> : vector<16x128xf32>
    %13 = tpu.matmul %11, %12, %cst_5 {dimension_numbers = #tpu.dot_dimension_numbers<[1], [0], [0], [1], [0, 0, 1, 1], [], []>} : vector<16x384xf32>, vector<384x128xf32>, vector<16x128xf32> -> vector<16x128xf32>
    %c0_6 = arith.constant 0 : index
    %c0_7 = arith.constant 0 : index
    %14 = vector.load %arg3[%c0_6, %c0_7] : memref<1x128xf32, #tpu.memory_space<vmem>>, vector<1x128xf32>
    %15 = vector.broadcast %14 : vector<1x128xf32> to vector<16x128xf32>
    %16 = arith.addf %13, %15 : vector<16x128xf32>
    %17 = math.tanh %16 : vector<16x128xf32>
    %cst_8 = arith.constant 1.000000e+00 : f32
    %18 = vector.broadcast %cst_8 : f32 to vector<16x128xf32>
    %cst_9 = arith.constant 2.000000e+00 : f32
    %19 = vector.broadcast %cst_9 : f32 to vector<16x128xf32>
    %20 = arith.mulf %19, %17 : vector<16x128xf32>
    %21 = arith.mulf %20, %17 : vector<16x128xf32>
    %22 = arith.subf %21, %18 : vector<16x128xf32>
    %cst_10 = arith.constant 2.000000e+00 : f32
    %23 = vector.broadcast %cst_10 : f32 to vector<16x128xf32>
    %24 = arith.mulf %23, %17 : vector<16x128xf32>
    %25 = arith.mulf %24, %22 : vector<16x128xf32>
    %26 = arith.subf %25, %17 : vector<16x128xf32>
    %27 = tpu.concatenate %17, %22, %26 in 1 : vector<16x128xf32>, vector<16x128xf32>, vector<16x128xf32> -> vector<16x384xf32>
    %c0_11 = arith.constant 0 : index
    %c0_12 = arith.constant 0 : index
    %28 = vector.load %arg4[%c0_11, %c0_12] : memref<384x128xf32, #tpu.memory_space<vmem>>, vector<384x128xf32>
    %cst_13 = arith.constant dense<0.000000e+00> : vector<16x128xf32>
    %29 = tpu.matmul %27, %28, %cst_13 {dimension_numbers = #tpu.dot_dimension_numbers<[1], [0], [0], [1], [0, 0, 1, 1], [], []>} : vector<16x384xf32>, vector<384x128xf32>, vector<16x128xf32> -> vector<16x128xf32>
    %c0_14 = arith.constant 0 : index
    %c0_15 = arith.constant 0 : index
    %30 = vector.load %arg5[%c0_14, %c0_15] : memref<1x128xf32, #tpu.memory_space<vmem>>, vector<1x128xf32>
    %31 = vector.broadcast %30 : vector<1x128xf32> to vector<16x128xf32>
    %32 = arith.addf %29, %31 : vector<16x128xf32>
    %33 = math.tanh %32 : vector<16x128xf32>
    %cst_16 = arith.constant 1.000000e+00 : f32
    %34 = vector.broadcast %cst_16 : f32 to vector<16x128xf32>
    %cst_17 = arith.constant 2.000000e+00 : f32
    %35 = vector.broadcast %cst_17 : f32 to vector<16x128xf32>
    %36 = arith.mulf %35, %33 : vector<16x128xf32>
    %37 = arith.mulf %36, %33 : vector<16x128xf32>
    %38 = arith.subf %37, %34 : vector<16x128xf32>
    %cst_18 = arith.constant 2.000000e+00 : f32
    %39 = vector.broadcast %cst_18 : f32 to vector<16x128xf32>
    %40 = arith.mulf %39, %33 : vector<16x128xf32>
    %41 = arith.mulf %40, %38 : vector<16x128xf32>
    %42 = arith.subf %41, %33 : vector<16x128xf32>
    %43 = tpu.concatenate %33, %38, %42 in 1 : vector<16x128xf32>, vector<16x128xf32>, vector<16x128xf32> -> vector<16x384xf32>
    %c0_19 = arith.constant 0 : index
    %c0_20 = arith.constant 0 : index
    %44 = vector.load %arg6[%c0_19, %c0_20] : memref<384x128xf32, #tpu.memory_space<vmem>>, vector<384x128xf32>
    %cst_21 = arith.constant dense<0.000000e+00> : vector<16x128xf32>
    %45 = tpu.matmul %43, %44, %cst_21 {dimension_numbers = #tpu.dot_dimension_numbers<[1], [0], [0], [1], [0, 0, 1, 1], [], []>} : vector<16x384xf32>, vector<384x128xf32>, vector<16x128xf32> -> vector<16x128xf32>
    %c0_22 = arith.constant 0 : index
    %c0_23 = arith.constant 0 : index
    %46 = vector.load %arg7[%c0_22, %c0_23] : memref<1x128xf32, #tpu.memory_space<vmem>>, vector<1x128xf32>
    %47 = vector.broadcast %46 : vector<1x128xf32> to vector<16x128xf32>
    %48 = arith.addf %45, %47 : vector<16x128xf32>
    %c0_24 = arith.constant 0 : index
    %c0_25 = arith.constant 0 : index
    %49 = vector.load %arg8[%c0_24, %c0_25] : memref<16x128xf32, #tpu.memory_space<vmem>>, vector<16x128xf32>
    tpu.vector_store %arg8[%c0_24, %c0_25], %48 {strides = array<i32>} : memref<16x128xf32, #tpu.memory_space<vmem>>, vector<16x128xf32>,
    return
  }
  func.func @transform_0(%arg0: i32) -> (i32, i32) {
    %c0_i32 = arith.constant 0 : i32
    %c0_i32_0 = arith.constant 0 : i32
    return %arg0, %c0_i32 : i32, i32
  }
  func.func @transform_1(%arg0: i32) -> (i32, i32) {
    %c0_i32 = arith.constant 0 : i32
    %c0_i32_0 = arith.constant 0 : i32
    %c0_i32_1 = arith.constant 0 : i32
    return %c0_i32, %c0_i32_0 : i32, i32
  }
  func.func @transform_2(%arg0: i32) -> (i32, i32) {
    %c0_i32 = arith.constant 0 : i32
    %c0_i32_0 = arith.constant 0 : i32
    %c0_i32_1 = arith.constant 0 : i32
    return %c0_i32, %c0_i32_0 : i32, i32
  }
  func.func @transform_3(%arg0: i32) -> (i32, i32) {
    %c0_i32 = arith.constant 0 : i32
    %c0_i32_0 = arith.constant 0 : i32
    %c0_i32_1 = arith.constant 0 : i32
    return %c0_i32, %c0_i32_0 : i32, i32
  }
  func.func @transform_4(%arg0: i32) -> (i32, i32) {
    %c0_i32 = arith.constant 0 : i32
    %c0_i32_0 = arith.constant 0 : i32
    %c0_i32_1 = arith.constant 0 : i32
    return %c0_i32, %c0_i32_0 : i32, i32
  }
  func.func @transform_5(%arg0: i32) -> (i32, i32) {
    %c0_i32 = arith.constant 0 : i32
    %c0_i32_0 = arith.constant 0 : i32
    %c0_i32_1 = arith.constant 0 : i32
    return %c0_i32, %c0_i32_0 : i32, i32
  }
  func.func @transform_6(%arg0: i32) -> (i32, i32) {
    %c0_i32 = arith.constant 0 : i32
    %c0_i32_0 = arith.constant 0 : i32
    %c0_i32_1 = arith.constant 0 : i32
    return %c0_i32, %c0_i32_0 : i32, i32
  }
  func.func @transform_7(%arg0: i32) -> (i32, i32) {
    %c0_i32 = arith.constant 0 : i32
    %c0_i32_0 = arith.constant 0 : i32
    return %arg0, %c0_i32 : i32, i32
  }
}

</mosaic_0001>

<bundles_post_ra>
// kernel: tpu_custom_call.1
= control target key start
LH: loop header
LB: loop body
LE: loop exit
PB: predicated region body
PF: predicated region fallthrough
CT: control target
= control target key end

     0   :  { %12 = vsyncpa [#allocation3], 0  ;;  %s1512_s0 = inlined_call_operand.hbm [shape: f32[16,128], index: 0, kind: input, shape index: {}]   ;;  %s1513_s1 = inlined_call_operand.hbm [shape: f32[384,128], index: 1, kind: input, shape index: {}]   ;;  %s1514_s2 = inlined_call_operand.vmem [shape: f32[1,128], index: 2, kind: input, shape index: {}]   ;;  %s1515_s3 = inlined_call_operand.hbm [shape: f32[384,128], index: 3, kind: input, shape index: {}]   ;;  %s1516_s4 = inlined_call_operand.vmem [shape: f32[1,128], index: 4, kind: input, shape index: {}]   ;;  %s1517_s5 = inlined_call_operand.hbm [shape: f32[384,128], index: 5, kind: input, shape index: {}]   ;;  %s1518_s6 = inlined_call_operand.vmem [shape: f32[1,128], index: 6, kind: input, shape index: {}]   ;;  %s1519_s7 = inlined_call_operand.hbm [shape: f32[16,128], index: 7, kind: output, shape index: {}]  }
   0x1   :  { %13 = vsyncpa [#allocation6], 0 }
   0x2   :  { %14 = vsyncpa [#allocation9], 0 }
   0x3   :  { %15 = vsyncpa [#allocation4], 0  ;;  %s1367_s24 = smov [#allocation5]   ;;  %s1368_s26 = smov [#allocation2]  }
   0x4   :  { %s33_s25 = sshll.u32 %s1367_s24, 4  ;;  %s21_s27 = sshll.u32 %s1368_s26, 4  ;;  %s34_s25 = int_to_ptr.vmem [resolvable:$true] %s33_s25  ;;  %s1414_s27 = int_to_ptr.vmem [resolvable:$true] %s21_s27 }
   0x5   :  { %s1249_s30 = scalar_lea.hbm %s1513_s1, 6144 }
   0x6   :  { %p1250_p0 = scmp.ne.s32.totalorder %s1513_s1, %s1249_s30  ;;  %p1253_p1 = scmp.lt.u32.totalorder %s1249_s30, %s1513_s1 }
   0x8   :  { %p1255_p2 = pnand %p1253_p1, %p1250_p0 }
   0xa   :  { %1258 = shalt.err (!%p1255_p2)
}
   0xb   :  { %s1259_s12 = scalar_lea.vmem %s34_s25, 6144  ;;  %p1264_p4 = scmp.lt.s32.totalorder %s34_s25, %s34_s25 }
   0xc   :  { %p1260_p3 = scmp.ne.s32.totalorder %s34_s25, %s1259_s12  ;;  %p1265_p5 = scmp.lt.s32.totalorder %s1259_s12, %s1259_s12 }
   0xe   :  { %p1266_p6 = por %p1265_p5, %p1264_p4 }
  0x10   :  { %p1267_p7 = pnand %p1266_p6, %p1260_p3 }
  0x12   :  { %1270 = shalt.err (!%p1267_p7)
}
  0x13   :  { %s1369_s13 = smov 128   ;;  %s1370_s14 = smov 8  }
  0x14   :  { %39 = dma.hbm_to_vmem [thread:$0]  %s1513_s1, 6144, %s34_s25, [#allocation6], %s1369_s13, %s1369_s13, %s1370_s14  }
  0x15   :  { %s1271_s19 = scalar_lea.hbm %s1512_s0, 256 }
  0x16   :  { %p1272_p8 = scmp.ne.s32.totalorder %s1512_s0, %s1271_s19  ;;  %p1275_p9 = scmp.lt.u32.totalorder %s1271_s19, %s1512_s0 }
  0x18   :  { %p1277_p10 = pnand %p1275_p9, %p1272_p8 }
  0x1a   :  { %1280 = shalt.err (!%p1277_p10)
}
  0x1b   :  { %s1281_s24 = scalar_lea.vmem %s1414_s27, 256  ;;  %p1286_p12 = scmp.lt.s32.totalorder %s1414_s27, %s1414_s27 }
  0x1c   :  { %p1282_p11 = scmp.ne.s32.totalorder %s1414_s27, %s1281_s24  ;;  %p1287_p13 = scmp.lt.s32.totalorder %s1281_s24, %s1281_s24 }
  0x1e   :  { %p1288_p0 = por %p1287_p13, %p1286_p12 }
  0x20   :  { %p1289_p1 = pnand %p1288_p0, %p1282_p11 }
  0x22   :  { %1292 = shalt.err (!%p1289_p1)
}
  0x23   :  { %27 = dma.hbm_to_vmem [thread:$0]  %s1512_s0, 256, %s1414_s27, [#allocation3], %s1369_s13, %s1369_s13, %s1370_s14  }
  0x24   :  { %s1371_s26 = smov [#allocation7]   ;;  %s1372_s29 = smov [#allocation8]  }
  0x25   :  { %s47_s28 = sshll.u32 %s1371_s26, 4  ;;  %s61_s30 = sshll.u32 %s1372_s29, 4  ;;  %s48_s28 = int_to_ptr.vmem [resolvable:$true] %s47_s28  ;;  %s1451_s30 = int_to_ptr.vmem [resolvable:$true] %s61_s30 }
  0x26   :  { %s1293_s10 = scalar_lea.hbm %s1515_s3, 6144 }
  0x27   :  { %p1294_p2 = scmp.ne.s32.totalorder %s1515_s3, %s1293_s10  ;;  %p1297_p3 = scmp.lt.u32.totalorder %s1293_s10, %s1515_s3 }
  0x29   :  { %p1299_p4 = pnand %p1297_p3, %p1294_p2 }
  0x2b   :  { %1302 = shalt.err (!%p1299_p4)
}
  0x2c   :  { %s1303_s0 = scalar_lea.vmem %s48_s28, 6144  ;;  %p1308_p6 = scmp.lt.s32.totalorder %s48_s28, %s48_s28 }
  0x2d   :  { %p1304_p5 = scmp.ne.s32.totalorder %s48_s28, %s1303_s0  ;;  %p1309_p7 = scmp.lt.s32.totalorder %s1303_s0, %s1303_s0 }
  0x2f   :  { %p1310_p8 = por %p1309_p7, %p1308_p6 }
  0x31   :  { %p1311_p9 = pnand %p1310_p8, %p1304_p5 }
  0x33   :  { %1314 = shalt.err (!%p1311_p9)
}
  0x34   :  { %53 = dma.hbm_to_vmem [thread:$0]  %s1515_s3, 6144, %s48_s28, [#allocation6], %s1369_s13, %s1369_s13, %s1370_s14  }
  0x35   :  { %s1315_s20 = scalar_lea.hbm %s1517_s5, 6144 }
  0x36   :  { %p1316_p10 = scmp.ne.s32.totalorder %s1517_s5, %s1315_s20  ;;  %p1319_p11 = scmp.lt.u32.totalorder %s1315_s20, %s1517_s5 }
  0x38   :  { %p1321_p12 = pnand %p1319_p11, %p1316_p10 }
  0x3a   :  { %1324 = shalt.err (!%p1321_p12)
}
  0x3b   :  { %s1325_s1 = scalar_lea.vmem %s1451_s30, 6144  ;;  %p1330_p0 = scmp.lt.s32.totalorder %s1451_s30, %s1451_s30 }
  0x3c   :  { %p1326_p13 = scmp.ne.s32.totalorder %s1451_s30, %s1325_s1  ;;  %p1331_p1 = scmp.lt.s32.totalorder %s1325_s1, %s1325_s1 }
  0x3e   :  { %p1332_p2 = por %p1331_p1, %p1330_p0 }
  0x40   :  { %p1333_p3 = pnand %p1332_p2, %p1326_p13 }
  0x42   :  { %1336 = shalt.err (!%p1333_p3)
}
  0x43   :  { %67 = dma.hbm_to_vmem [thread:$0]  %s1517_s5, 6144, %s1451_s30, [#allocation9], %s1369_s13, %s1369_s13, %s1370_s14  }
  0x44   :  { %1359 = dma.done.wait [#allocation3], 256  }
  0x45   :  { %1360 = vsyncadd [#allocation3], 4294967040 }
  0x46   :  { %1361 = dma.done.wait [#allocation6], 12288  }
  0x47   :  { %1362 = vsyncadd [#allocation6], 4294955008 }
  0x48   :  { %1363 = dma.done.wait [#allocation9], 6144  }
  0x49   :  { %1364 = vsyncadd [#allocation9], 4294961152  ;;  %v112_v0 = vld [vmem:[#allocation5 + $0x80] sm:$0xff]  ;;  %v113_v1 = vld [vmem:[#allocation5 + $0x88] sm:$0xff]  ;;  %s1373_s30 = smov [#allocation10]  }
  0x4a   :  { %v96_v2 = vld [vmem:[#allocation5] sm:$0xff]  ;;  %v1038_v3 = vpack.c.bf16 %v113_v1, %v112_v0  ;;  %v97_v4 = vld [vmem:[#allocation5 + $0x8] sm:$0xff]  ;;  %v114_v5 = vld [vmem:[#allocation5 + $0x90] sm:$0xff]  ;;  %s742_s8 = sshll.u32 %s1373_s30, 4  ;;  %s743_s8 = int_to_ptr.vmem [resolvable:$true] %s742_s8 }
  0x4b   :  { %v115_v6 = vld [vmem:[#allocation5 + $0x98] sm:$0xff]  ;;  %v1040_v7 = vpack.c.bf16 %v97_v4, %v96_v2  ;;  %v128_v9 = vld [vmem:[#allocation5 + $0x100] sm:$0xff]  ;;  %v129_v10 = vld [vmem:[#allocation5 + $0x108] sm:$0xff]  ;;  %s1337_s9 = scalar_lea.vmem %s743_s8, 256  ;;  %p1342_p5 = scmp.lt.s32.totalorder %s743_s8, %s743_s8 }
  0x4c   :  { %v1042_v8 = vpack.c.bf16 %v115_v6, %v114_v5  ;;  %v98_v11 = vld [vmem:[#allocation5 + $0x10] sm:$0xff]  ;;  %1039 = vmatprep.subr.bf16.mxu0 %v1038_v3  ;;  %v1070_v12 = vpack.c.bf16 %v129_v10, %v128_v9  ;;  %v99_v13 = vld [vmem:[#allocation5 + $0x18] sm:$0xff]  ;;  %v116_v14 = vld [vmem:[#allocation5 + $0xa0] sm:$0xff]  ;;  %p1338_p4 = scmp.ne.s32.totalorder %s743_s8, %s1337_s9  ;;  %p1343_p6 = scmp.lt.s32.totalorder %s1337_s9, %s1337_s9 }
  0x4d   :  { %v117_v15 = vld [vmem:[#allocation5 + $0xa8] sm:$0xff]  ;;  %1041 = vmatpush3.bf16.msra.mxu0 %v1040_v7  ;;  %v1044_v16 = vpack.c.bf16 %v99_v13, %v98_v11  ;;  %v130_v17 = vld [vmem:[#allocation5 + $0x110] sm:$0xff]  ;;  %v131_v18 = vld [vmem:[#allocation5 + $0x118] sm:$0xff] }
  0x4e   :  { %1043 = vmatprep.subr.bf16.mxu0 %v1042_v8  ;;  %1071 = vmatprep.subr.bf16.mxu1 %v1070_v12  ;;  %v1046_v19 = vpack.c.bf16 %v117_v15, %v116_v14  ;;  %v1074_v20 = vpack.c.bf16 %v131_v18, %v130_v17  ;;  %v100_v21 = vld [vmem:[#allocation5 + $0x20] sm:$0xff]  ;;  %v101_v22 = vld [vmem:[#allocation5 + $0x28] sm:$0xff]  ;;  %v118_v23 = vld [vmem:[#allocation5 + $0xb0] sm:$0xff]  ;;  %p1344_p7 = por %p1343_p6, %p1342_p5 }
  0x4f   :  { %1073 = vmatpush3.bf16.msra.mxu1 %v1070_v12  ;;  %v119_v24 = vld [vmem:[#allocation5 + $0xb8] sm:$0xff]  ;;  %v132_v25 = vld [vmem:[#allocation5 + $0x120] sm:$0xff]  ;;  %v133_v26 = vld [vmem:[#allocation5 + $0x128] sm:$0xff]  ;;  %v1048_v28 = vpack.c.bf16 %v101_v22, %v100_v21 }
  0x50   :  { %1075 = vmatprep.subr.bf16.mxu1 %v1074_v20  ;;  %v1078_v27 = vpack.c.bf16 %v133_v26, %v132_v25  ;;  %v134_v29 = vld [vmem:[#allocation5 + $0x130] sm:$0xff]  ;;  %v135_v30 = vld [vmem:[#allocation5 + $0x138] sm:$0xff]  ;;  %v1050_v31 = vpack.c.bf16 %v119_v24, %v118_v23  ;;  %v120_v34 = vld [vmem:[#allocation5 + $0xc0] sm:$0xff]  ;;  %p1345_p8 = pnand %p1344_p7, %p1338_p4 }
  0x51   :  { %1045 = vmatpush3.bf16.msra.mxu0 %v1044_v16  ;;  %v102_v32 = vld [vmem:[#allocation5 + $0x30] sm:$0xff]  ;;  %v103_v33 = vld [vmem:[#allocation5 + $0x38] sm:$0xff]  ;;  %v121_v35 = vld [vmem:[#allocation5 + $0xc8] sm:$0xff]  ;;  %v1082_v36 = vpack.c.bf16 %v135_v30, %v134_v29 }
  0x52   :  { %1047 = vmatprep.subr.bf16.mxu0 %v1046_v19  ;;  %v1052_v37 = vpack.c.bf16 %v103_v33, %v102_v32  ;;  %v136_v38 = vld [vmem:[#allocation5 + $0x140] sm:$0xff]  ;;  %v137_v39 = vld [vmem:[#allocation5 + $0x148] sm:$0xff]  ;;  %v1054_v40 = vpack.c.bf16 %v121_v35, %v120_v34  ;;  %v122_v43 = vld [vmem:[#allocation5 + $0xd0] sm:$0xff] }
  0x53   :  { %1077 = vmatpush3.bf16.msra.mxu1 %v1074_v20  ;;  %v104_v41 = vld [vmem:[#allocation5 + $0x40] sm:$0xff]  ;;  %v105_v42 = vld [vmem:[#allocation5 + $0x48] sm:$0xff]  ;;  %v123_v44 = vld [vmem:[#allocation5 + $0xd8] sm:$0xff]  ;;  %v1086_v45 = vpack.c.bf16 %v137_v39, %v136_v38 }
  0x54   :  { %1079 = vmatprep.subr.bf16.mxu1 %v1078_v27  ;;  %v82_v46 = vld [vmem:[#allocation2] sm:$0xff]  ;;  %v1056_v47 = vpack.c.bf16 %v105_v42, %v104_v41  ;;  %v139_v49 = vld [vmem:[#allocation5 + $0x158] sm:$0xff]  ;;  %v1058_v51 = vpack.c.bf16 %v123_v44, %v122_v43  ;;  %v124_v54 = vld [vmem:[#allocation5 + $0xe0] sm:$0xff] }
  0x55   :  { %1049 = vmatpush3.bf16.msra.mxu0 %v1048_v28  ;;  %v138_v48 = vld [vmem:[#allocation5 + $0x150] sm:$0xff]  ;;  %1237 = vtanh.f32 %v82_v46  ;;  %v83_v50 = vld [vmem:[#allocation2 + $0x8] sm:$0xff]  ;;  %v125_v55 = vld [vmem:[#allocation5 + $0xe8] sm:$0xff] }
  0x56   :  { %1051 = vmatprep.subr.bf16.mxu0 %v1050_v31  ;;  %v106_v52 = vld [vmem:[#allocation5 + $0x50] sm:$0xff]  ;;  %v107_v53 = vld [vmem:[#allocation5 + $0x58] sm:$0xff]  ;;  %1239 = vtanh.f32 %v83_v50  ;;  %v1090_v56 = vpack.c.bf16 %v139_v49, %v138_v48  ;;  %v140_v58 = vld [vmem:[#allocation5 + $0x160] sm:$0xff]  ;;  %v1062_v60 = vpack.c.bf16 %v125_v55, %v124_v54 }
  0x57   :  { %1081 = vmatpush3.bf16.msra.mxu1 %v1078_v27  ;;  %v1060_v57 = vpack.c.bf16 %v107_v53, %v106_v52  ;;  %v141_v59 = vld [vmem:[#allocation5 + $0x168] sm:$0xff]  ;;  %v108_v61 = vld [vmem:[#allocation5 + $0x60] sm:$0xff]  ;;  %v126_v63 = vld [vmem:[#allocation5 + $0xf0] sm:$0xff] }
  0x58   :  { %1083 = vmatprep.subr.bf16.mxu1 %v1082_v36  ;;  %v109_v62 = vld [vmem:[#allocation5 + $0x68] sm:$0xff]  ;;  %v127_v0 = vld [vmem:[#allocation5 + $0xf8] sm:$0xff]  ;;  %v1094_v1 = vpack.c.bf16 %v141_v59, %v140_v58  ;;  %v142_v3 = vld [vmem:[#allocation5 + $0x170] sm:$0xff] }
  0x59   :  { %1053 = vmatpush3.bf16.msra.mxu0 %v1052_v37  ;;  %v1064_v2 = vpack.c.bf16 %v109_v62, %v108_v61  ;;  %v143_v4 = vld [vmem:[#allocation5 + $0x178] sm:$0xff]  ;;  %v1066_v5 = vpack.c.bf16 %v127_v0, %v126_v63  ;;  %v110_v6 = vld [vmem:[#allocation5 + $0x70] sm:$0xff]  ;;  %v329_v9 = vld [vmem:[#allocation7 + $0x80] sm:$0xff] }
  0x5a   :  { %1055 = vmatprep.subr.bf16.mxu0 %v1054_v40  ;;  %v111_v7 = vld [vmem:[#allocation5 + $0x78] sm:$0xff]  ;;  %v330_v10 = vld [vmem:[#allocation7 + $0x88] sm:$0xff]  ;;  %v1098_v13 = vpack.c.bf16 %v143_v4, %v142_v3  ;;  %v313_v18 = vld [vmem:[#allocation7] sm:$0xff] }
  0x5b   :  { %1085 = vmatpush3.bf16.msra.mxu1 %v1082_v36  ;;  %v1068_v14 = vpack.c.bf16 %v111_v7, %v110_v6  ;;  %v1102_v17 = vpack.c.bf16 %v330_v10, %v329_v9  ;;  %v314_v19 = vld [vmem:[#allocation7 + $0x8] sm:$0xff]  ;;  %v331_v21 = vld [vmem:[#allocation7 + $0x90] sm:$0xff]  ;;  %v332_v22 = vld [vmem:[#allocation7 + $0x98] sm:$0xff] }
  0x5c   :  { %1087 = vmatprep.subr.bf16.mxu1 %v1086_v45  ;;  %v1104_v25 = vpack.c.bf16 %v314_v19, %v313_v18  ;;  %v1106_v27 = vpack.c.bf16 %v332_v22, %v331_v21  ;;  %v315_v28 = vld [vmem:[#allocation7 + $0x10] sm:$0xff]  ;;  %v316_v29 = vld [vmem:[#allocation7 + $0x18] sm:$0xff]  ;;  %v345_v34 = vld [vmem:[#allocation7 + $0x100] sm:$0xff] }
  0x5d   :  { %1057 = vmatpush3.bf16.msra.mxu0 %v1056_v47  ;;  %v1108_v33 = vpack.c.bf16 %v316_v29, %v315_v28  ;;  %v346_v35 = vld [vmem:[#allocation7 + $0x108] sm:$0xff]  ;;  %v333_v37 = vld [vmem:[#allocation7 + $0xa0] sm:$0xff]  ;;  %v347_v43 = vld [vmem:[#allocation7 + $0x110] sm:$0xff] }
  0x5e   :  { %1059 = vmatprep.subr.bf16.mxu0 %v1058_v51  ;;  %v1134_v36 = vpack.c.bf16 %v346_v35, %v345_v34  ;;  %v334_v38 = vld [vmem:[#allocation7 + $0xa8] sm:$0xff]  ;;  %v317_v40 = vld [vmem:[#allocation7 + $0x20] sm:$0xff]  ;;  %v348_v44 = vld [vmem:[#allocation7 + $0x118] sm:$0xff] }
  0x5f   :  { %1089 = vmatpush3.bf16.msra.mxu1 %v1086_v45  ;;  %v1238_v8 = vpop.eup %1237  ;;  %v1110_v39 = vpack.c.bf16 %v334_v38, %v333_v37  ;;  %v318_v41 = vld [vmem:[#allocation7 + $0x28] sm:$0xff]  ;;  %v1138_v45 = vpack.c.bf16 %v348_v44, %v347_v43  ;;  %v335_v46 = vld [vmem:[#allocation7 + $0xb0] sm:$0xff]  ;;  %v336_v47 = vld [vmem:[#allocation7 + $0xb8] sm:$0xff] }
  0x60   :  { %1091 = vmatprep.subr.bf16.mxu1 %v1090_v56  ;;  %v1240_v11 = vpop.eup %1239  ;;  %v86_v12 = vmul.f32 2.0, %v1238_v8  ;;  %v1112_v42 = vpack.c.bf16 %v318_v41, %v317_v40  ;;  %v1114_v48 = vpack.c.bf16 %v336_v47, %v335_v46  ;;  %v319_v49 = vld [vmem:[#allocation7 + $0x30] sm:$0xff]  ;;  %v320_v50 = vld [vmem:[#allocation7 + $0x38] sm:$0xff]  ;;  %v349_v52 = vld [vmem:[#allocation7 + $0x120] sm:$0xff] }
  0x61   :  { %1061 = vmatpush3.bf16.msra.mxu0 %v1060_v57  ;;  %v87_v15 = vmul.f32 2.0, %v1240_v11  ;;  %v1116_v51 = vpack.c.bf16 %v320_v50, %v319_v49  ;;  %v350_v53 = vld [vmem:[#allocation7 + $0x128] sm:$0xff]  ;;  %v337_v55 = vld [vmem:[#allocation7 + $0xc0] sm:$0xff]  ;;  %v351_v61 = vld [vmem:[#allocation7 + $0x130] sm:$0xff] }
  0x62   :  { %1063 = vmatprep.subr.bf16.mxu0 %v1062_v60  ;;  %v88_v16 = vmul.f32 %v1238_v8, %v86_v12  ;;  %v1142_v54 = vpack.c.bf16 %v350_v53, %v349_v52  ;;  %v321_v58 = vld [vmem:[#allocation7 + $0x40] sm:$0xff]  ;;  %v322_v59 = vld [vmem:[#allocation7 + $0x48] sm:$0xff]  ;;  %v352_v62 = vld [vmem:[#allocation7 + $0x138] sm:$0xff] }
  0x63   :  { %1093 = vmatpush3.bf16.msra.mxu1 %v1090_v56  ;;  %v89_v20 = vmul.f32 %v1240_v11, %v87_v15  ;;  %v338_v56 = vld [vmem:[#allocation7 + $0xc8] sm:$0xff]  ;;  %v1120_v60 = vpack.c.bf16 %v322_v59, %v321_v58  ;;  %v1146_v63 = vpack.c.bf16 %v352_v62, %v351_v61  ;;  %v339_v0 = vld [vmem:[#allocation7 + $0xd0] sm:$0xff]  ;;  %v324_v4 = vld [vmem:[#allocation7 + $0x58] sm:$0xff] }
  0x64   :  { %1095 = vmatprep.subr.bf16.mxu1 %v1094_v1  ;;  %v756_v23 = vadd.f32 -1.0, %v88_v16  ;;  %v1118_v57 = vpack.c.bf16 %v338_v56, %v337_v55  ;;  %v323_v3 = vld [vmem:[#allocation7 + $0x50] sm:$0xff]  ;;  %v354_v7 = vld [vmem:[#allocation7 + $0x148] sm:$0xff]  ;;  %v356_v16 = vld [vmem:[#allocation7 + $0x158] sm:$0xff] }
  0x65   :  { %1065 = vmatpush3.bf16.msra.mxu0 %v1064_v2  ;;  %v757_v24 = vadd.f32 -1.0, %v89_v20  ;;  %v1124_v6 = vpack.c.bf16 %v324_v4, %v323_v3  ;;  %v342_v9 = vld [vmem:[#allocation7 + $0xe8] sm:$0xff]  ;;  %v344_v18 = vld [vmem:[#allocation7 + $0xf8] sm:$0xff]  ;;  %v327_v21 = vld [vmem:[#allocation7 + $0x70] sm:$0xff] }
  0x66   :  { %1067 = vmatprep.subr.bf16.mxu0 %v1066_v5  ;;  %215 = vmatprep.mubr.f32.mxu0 %v756_v23  ;;  %v92_v26 = vmul.f32 %v756_v23, %v86_v12  ;;  %v353_v5 = vld [vmem:[#allocation7 + $0x140] sm:$0xff]  ;;  %v328_v22 = vld [vmem:[#allocation7 + $0x78] sm:$0xff]  ;;  %v758_v35 = vld [vmem:[%s1514_s2] ss:$0 sm:$0xff] }
  0x67   :  { %1097 = vmatpush3.bf16.msra.mxu1 %v1094_v1  ;;  %v93_v30 = vmul.f32 %v757_v24, %v87_v15  ;;  %v340_v1 = vld [vmem:[#allocation7 + $0xd8] sm:$0xff]  ;;  %v1150_v10 = vpack.c.bf16 %v354_v7, %v353_v5  ;;  %v325_v12 = vld [vmem:[#allocation7 + $0x60] sm:$0xff]  ;;  %v1132_v23 = vpack.c.bf16 %v328_v22, %v327_v21  ;;  %v531_v49 = vld [vmem:[#allocation8 + $0x8] sm:$0xff] }
  0x68   :  { %1099 = vmatprep.subr.bf16.mxu1 %v1098_v13  ;;  %v94_v31 = vsub.f32 %v92_v26, %v1238_v8  ;;  %v1122_v2 = vpack.c.bf16 %v340_v1, %v339_v0  ;;  %v360_v28 = vld [vmem:[#allocation7 + $0x178] sm:$0xff]  ;;  %v548_v61 = vld [vmem:[#allocation8 + $0x90] sm:$0xff]  ;;  %v563_v1 = vld [vmem:[#allocation8 + $0x108] sm:$0xff] }
  0x69   :  { %1069 = vmatpush3.bf16.msra.mxu0 %v1068_v14  ;;  %v95_v32 = vsub.f32 %v93_v30, %v1240_v11  ;;  %v355_v14 = vld [vmem:[#allocation7 + $0x150] sm:$0xff]  ;;  %v546_v30 = vld [vmem:[#allocation8 + $0x80] sm:$0xff]  ;;  %v549_v62 = vld [vmem:[#allocation8 + $0x98] sm:$0xff] }
  0x6a   :  { %1103 = vmatprep.subr.bf16.mxu0 %v1102_v17  ;;  %965 = vmatprep.mubr.f32.mxu1 %v94_v31  ;;  %v343_v17 = vld [vmem:[#allocation7 + $0xf0] sm:$0xff]  ;;  %v1154_v19 = vpack.c.bf16 %v356_v16, %v355_v14  ;;  %v547_v31 = vld [vmem:[#allocation8 + $0x88] sm:$0xff]  ;;  %v1170_v0 = vpack.c.bf16 %v549_v62, %v548_v61  ;;  %v533_v3 = vld [vmem:[#allocation8 + $0x18] sm:$0xff] }
  0x6b   :  { %1101 = vmatpush3.bf16.msra.mxu1 %v1098_v13  ;;  %v326_v13 = vld [vmem:[#allocation7 + $0x68] sm:$0xff]  ;;  %v1130_v20 = vpack.c.bf16 %v344_v18, %v343_v17  ;;  %v553_v16 = vld [vmem:[#allocation8 + $0xb8] sm:$0xff]  ;;  %v566_v17 = vld [vmem:[#allocation8 + $0x120] sm:$0xff] }
  0x6c   :  { %216 = vmatmul.mubr.f32.vlgmr.msra.gmra.mrb[0].mxu0 %v1238_v8  ;;  %1135 = vmatprep.subr.bf16.mxu1 %v1134_v36  ;;  %v341_v8 = vld [vmem:[#allocation7 + $0xe0] sm:$0xff]  ;;  %v1128_v15 = vpack.c.bf16 %v326_v13, %v325_v12  ;;  %v551_v7 = vld [vmem:[#allocation8 + $0xa8] sm:$0xff]  ;;  %v537_v21 = vld [vmem:[#allocation8 + $0x38] sm:$0xff] }
  0x6d   :  { %220 = vmatprep.mubr.f32.mxu0 %v757_v24  ;;  %1105 = vmatpush3.bf16.msra.mxu0 %v1104_v25  ;;  %v357_v24 = vld [vmem:[#allocation7 + $0x160] sm:$0xff]  ;;  %v358_v25 = vld [vmem:[#allocation7 + $0x168] sm:$0xff]  ;;  %v577_v61 = vld [vmem:[#allocation8 + $0x178] sm:$0xff] }
  0x6e   :  { %1107 = vmatprep.subr.bf16.mxu0 %v1106_v27  ;;  %966 = vmatmul.mubr.f32.vlgmr.msra.gmra.mrb[0].mxu1 %v95_v32  ;;  %v1158_v26 = vpack.c.bf16 %v358_v25, %v357_v24  ;;  %v359_v27 = vld [vmem:[#allocation7 + $0x170] sm:$0xff]  ;;  %v1166_v32 = vpack.c.bf16 %v547_v31, %v546_v30  ;;  %v535_v12 = vld [vmem:[#allocation8 + $0x28] sm:$0xff]  ;;  %v554_v24 = vld [vmem:[#allocation8 + $0xc0] sm:$0xff] }
  0x6f   :  { %1137 = vmatpush3.bf16.msra.mxu1 %v1134_v36  ;;  %v1162_v29 = vpack.c.bf16 %v360_v28, %v359_v27  ;;  %v555_v25 = vld [vmem:[#allocation8 + $0xc8] sm:$0xff]  ;;  %v569_v28 = vld [vmem:[#allocation8 + $0x138] sm:$0xff] }
  0x70   :  { %221 = vmatmul.mubr.f32.gmra.mrb[2].mxu0 %v1240_v11  ;;  %1139 = vmatprep.subr.bf16.mxu1 %v1138_v45  ;;  %v1126_v11 = vpack.c.bf16 %v342_v9, %v341_v8  ;;  %v564_v8 = vld [vmem:[#allocation8 + $0x110] sm:$0xff]  ;;  %v1182_v27 = vpack.c.bf16 %v555_v25, %v554_v24  ;;  %v539_v30 = vld [vmem:[#allocation8 + $0x48] sm:$0xff] }
  0x71   :  { %1109 = vmatpush3.bf16.msra.mxu0 %v1108_v33 }
  0x72   :  { %1111 = vmatprep.subr.bf16.mxu0 %v1110_v39 }
  0x73   :  { %1141 = vmatpush3.bf16.msra.mxu1 %v1138_v45 }
  0x74   :  { %1143 = vmatprep.subr.bf16.mxu1 %v1142_v54 }
  0x75   :  { %1113 = vmatpush3.bf16.msra.mxu0 %v1112_v42 }
  0x76   :  { %1115 = vmatprep.subr.bf16.mxu0 %v1114_v48  ;;  %v530_v48 = vld [vmem:[#allocation8] sm:$0xff] }
  0x77   :  { %1145 = vmatpush3.bf16.msra.mxu1 %v1142_v54  ;;  %v1168_v54 = vpack.c.bf16 %v531_v49, %v530_v48  ;;  %v543_v48 = vld [vmem:[#allocation8 + $0x68] sm:$0xff] }
  0x78   :  { %1147 = vmatprep.subr.bf16.mxu1 %v1146_v63 }
  0x79   :  { %1117 = vmatpush3.bf16.msra.mxu0 %v1116_v51 }
  0x7a   :  { %1119 = vmatprep.subr.bf16.mxu0 %v1118_v57 }
  0x7b   :  { %1149 = vmatpush3.bf16.msra.mxu1 %v1146_v63  ;;  %v562_v63 = vld [vmem:[#allocation8 + $0x100] sm:$0xff] }
  0x7c   :  { %1151 = vmatprep.subr.bf16.mxu1 %v1150_v10  ;;  %v1198_v4 = vpack.c.bf16 %v563_v1, %v562_v63 }
  0x7d   :  { %1121 = vmatpush3.bf16.msra.mxu0 %v1120_v60 }
  0x7e   :  { %1123 = vmatprep.subr.bf16.mxu0 %v1122_v2  ;;  %v532_v2 = vld [vmem:[#allocation8 + $0x10] sm:$0xff] }
  0x7f   :  { %1153 = vmatpush3.bf16.msra.mxu1 %v1150_v10  ;;  %v1172_v5 = vpack.c.bf16 %v533_v3, %v532_v2  ;;  %v565_v10 = vld [vmem:[#allocation8 + $0x118] sm:$0xff]  ;;  %v761_v3 = vld [vmem:[%s1516_s4] ss:$0 sm:$0xff] }
  0x80   :  { %1155 = vmatprep.subr.bf16.mxu1 %v1154_v19  ;;  %v1202_v13 = vpack.c.bf16 %v565_v10, %v564_v8 }
  0x81   :  { %1125 = vmatpush3.bf16.msra.mxu0 %v1124_v6  ;;  %v550_v6 = vld [vmem:[#allocation8 + $0xa0] sm:$0xff] }
  0x82   :  { %1127 = vmatprep.subr.bf16.mxu0 %v1126_v11  ;;  %v1174_v9 = vpack.c.bf16 %v551_v7, %v550_v6  ;;  %v534_v11 = vld [vmem:[#allocation8 + $0x20] sm:$0xff] }
  0x83   :  { %1157 = vmatpush3.bf16.msra.mxu1 %v1154_v19  ;;  %v1176_v14 = vpack.c.bf16 %v535_v12, %v534_v11  ;;  %v567_v19 = vld [vmem:[#allocation8 + $0x128] sm:$0xff] }
  0x84   :  { %1159 = vmatprep.subr.bf16.mxu1 %v1158_v26  ;;  %v1206_v22 = vpack.c.bf16 %v567_v19, %v566_v17 }
  0x85   :  { %1129 = vmatpush3.bf16.msra.mxu0 %v1128_v15  ;;  %v552_v15 = vld [vmem:[#allocation8 + $0xb0] sm:$0xff] }
  0x86   :  { %1131 = vmatprep.subr.bf16.mxu0 %v1130_v20  ;;  %v1178_v18 = vpack.c.bf16 %v553_v16, %v552_v15  ;;  %v536_v20 = vld [vmem:[#allocation8 + $0x30] sm:$0xff] }
  0x87   :  { %1161 = vmatpush3.bf16.msra.mxu1 %v1158_v26  ;;  %v568_v26 = vld [vmem:[#allocation8 + $0x130] sm:$0xff] }
  0x88   :  { %1163 = vmatprep.subr.bf16.mxu1 %v1162_v29  ;;  %v1210_v31 = vpack.c.bf16 %v569_v28, %v568_v26  ;;  %v764_v26 = vld [vmem:[%s1518_s6] ss:$0 sm:$0xff] }
  0x89   :  { %1133 = vmatpush3.bf16.msra.mxu0 %v1132_v23  ;;  %v1180_v23 = vpack.c.bf16 %v537_v21, %v536_v20 }
  0x8a   :  { %1167 = vmatprep.subr.bf16.mxu0 %v1166_v32 }
  0x8b   :  { %1165 = vmatpush3.bf16.msra.mxu1 %v1162_v29  ;;  %v538_v29 = vld [vmem:[#allocation8 + $0x40] sm:$0xff] }
  0x8c   :  { %1199 = vmatprep.subr.bf16.mxu1 %v1198_v4  ;;  %v1184_v32 = vpack.c.bf16 %v539_v30, %v538_v29 }
 0x13f   :  { %v797_v33 = vpop.f32.mrb[0].mxu0 }
 0x140   :  { %v798_v34 = vpop.f32.mrb[1].mxu0 }
 0x141   :  { %v799_v36 = vadd.f32 %v798_v34, %v797_v33  ;;  %v967_v37 = vpop.f32.mrb[0].mxu1  ;;  %v556_v33 = vld [vmem:[#allocation8 + $0xd0] sm:$0xff]  ;;  %v557_v34 = vld [vmem:[#allocation8 + $0xd8] sm:$0xff] }
 0x142   :  { %v292_v40 = vpop.f32.mrb[1].mxu1 }
 0x143   :  { %v800_v38 = vpop.f32.mrb[2].mxu0  ;;  %v218_v39 = vadd.f32 %v799_v36, %v758_v35  ;;  %v1186_v36 = vpack.c.bf16 %v557_v34, %v556_v33 }
 0x144   :  { %v801_v41 = vpop.f32.mrb[3].mxu0 }
 0x145   :  { %v802_v42 = vadd.f32 %v801_v41, %v800_v38  ;;  %v293_v43 = vadd.f32 %v292_v40, %v218_v39  ;;  %v540_v38 = vld [vmem:[#allocation8 + $0x50] sm:$0xff]  ;;  %v541_v39 = vld [vmem:[#allocation8 + $0x58] sm:$0xff] }
 0x146   :  { %v1188_v41 = vpack.c.bf16 %v541_v39, %v540_v38 }
 0x147   :  { %v223_v44 = vadd.f32 %v802_v42, %v758_v35  ;;  %1241 = vtanh.f32 %v293_v43  ;;  %v570_v35 = vld [vmem:[#allocation8 + $0x140] sm:$0xff]  ;;  %v559_v43 = vld [vmem:[#allocation8 + $0xe8] sm:$0xff] }
 0x148   :  { %v558_v42 = vld [vmem:[#allocation8 + $0xe0] sm:$0xff] }
 0x149   :  { %v298_v45 = vadd.f32 %v967_v37, %v223_v44  ;;  %v571_v37 = vld [vmem:[#allocation8 + $0x148] sm:$0xff]  ;;  %v572_v44 = vld [vmem:[#allocation8 + $0x150] sm:$0xff] }
 0x14a   :  { %v1214_v40 = vpack.c.bf16 %v571_v37, %v570_v35 }
 0x14b   :  { %1243 = vtanh.f32 %v298_v45  ;;  %v1190_v45 = vpack.c.bf16 %v559_v43, %v558_v42 }
 0x151   :  { %v1242_v46 = vpop.eup %1241 }
 0x152   :  { %v303_v47 = vmul.f32 2.0, %v1242_v46 }
 0x154   :  { %v305_v50 = vmul.f32 %v1242_v46, %v303_v47 }
 0x155   :  { %v1244_v51 = vpop.eup %1243 }
 0x156   :  { %v759_v52 = vadd.f32 -1.0, %v305_v50  ;;  %v304_v53 = vmul.f32 2.0, %v1244_v51  ;;  %v560_v50 = vld [vmem:[#allocation8 + $0xf0] sm:$0xff] }
 0x158   :  { %432 = vmatprep.mubr.f32.mxu0 %v759_v52  ;;  %v306_v55 = vmul.f32 %v1244_v51, %v304_v53  ;;  %v309_v56 = vmul.f32 %v759_v52, %v303_v47  ;;  %v542_v47 = vld [vmem:[#allocation8 + $0x60] sm:$0xff] }
 0x159   :  { %433 = vmatmul.mubr.f32.vlgmr.msra.gmra.mrb[4].mxu0 %v1242_v46  ;;  %v574_v52 = vld [vmem:[#allocation8 + $0x160] sm:$0xff] }
 0x15a   :  { %v760_v57 = vadd.f32 -1.0, %v306_v55  ;;  %v311_v58 = vsub.f32 %v309_v56, %v1242_v46  ;;  %1169 = vmatpush3.bf16.msra.mxu0 %v1168_v54  ;;  %v573_v46 = vld [vmem:[#allocation8 + $0x158] sm:$0xff]  ;;  %v1192_v54 = vpack.c.bf16 %v543_v48, %v542_v47  ;;  %v544_v56 = vld [vmem:[#allocation8 + $0x70] sm:$0xff] }
 0x15b   :  { %1171 = vmatprep.subr.bf16.mxu0 %v1170_v0  ;;  %v1218_v49 = vpack.c.bf16 %v573_v46, %v572_v44 }
 0x15c   :  { %v310_v59 = vmul.f32 %v760_v57, %v304_v53  ;;  %437 = vmatprep.mubr.f32.mxu0 %v760_v57  ;;  %1000 = vmatprep.mubr.f32.mxu1 %v311_v58  ;;  %v575_v53 = vld [vmem:[#allocation8 + $0x168] sm:$0xff]  ;;  %v545_v57 = vld [vmem:[#allocation8 + $0x78] sm:$0xff] }
 0x15d   :  { %438 = vmatmul.mubr.f32.gmra.mrb[6].mxu0 %v1244_v51  ;;  %v1222_v58 = vpack.c.bf16 %v575_v53, %v574_v52 }
 0x15e   :  { %v312_v60 = vsub.f32 %v310_v59, %v1244_v51  ;;  %1173 = vmatpush3.bf16.msra.mxu0 %v1172_v5  ;;  %v561_v51 = vld [vmem:[#allocation8 + $0xf8] sm:$0xff]  ;;  %v1196_v59 = vpack.c.bf16 %v545_v57, %v544_v56 }
 0x15f   :  { %1175 = vmatprep.subr.bf16.mxu0 %v1174_v9  ;;  %v1194_v55 = vpack.c.bf16 %v561_v51, %v560_v50 }
 0x160   :  { %1001 = vmatmul.mubr.f32.vlgmr.msra.gmra.mrb[2].mxu1 %v312_v60  ;;  %v576_v60 = vld [vmem:[#allocation8 + $0x170] sm:$0xff] }
 0x161   :  { %1201 = vmatpush3.bf16.msra.mxu1 %v1198_v4  ;;  %v1226_v62 = vpack.c.bf16 %v577_v61, %v576_v60 }
 0x162   :  { %1203 = vmatprep.subr.bf16.mxu1 %v1202_v13  ;;  %1177 = vmatpush3.bf16.msra.mxu0 %v1176_v14 }
 0x163   :  { %1179 = vmatprep.subr.bf16.mxu0 %v1178_v18 }
 0x165   :  { %1205 = vmatpush3.bf16.msra.mxu1 %v1202_v13 }
 0x166   :  { %1207 = vmatprep.subr.bf16.mxu1 %v1206_v22  ;;  %1181 = vmatpush3.bf16.msra.mxu0 %v1180_v23 }
 0x167   :  { %1183 = vmatprep.subr.bf16.mxu0 %v1182_v27 }
 0x169   :  { %1209 = vmatpush3.bf16.msra.mxu1 %v1206_v22 }
 0x16a   :  { %1211 = vmatprep.subr.bf16.mxu1 %v1210_v31  ;;  %1185 = vmatpush3.bf16.msra.mxu0 %v1184_v32 }
 0x16b   :  { %1187 = vmatprep.subr.bf16.mxu0 %v1186_v36 }
 0x16d   :  { %1213 = vmatpush3.bf16.msra.mxu1 %v1210_v31 }
 0x16e   :  { %1215 = vmatprep.subr.bf16.mxu1 %v1214_v40  ;;  %1189 = vmatpush3.bf16.msra.mxu0 %v1188_v41 }
 0x16f   :  { %1191 = vmatprep.subr.bf16.mxu0 %v1190_v45 }
 0x171   :  { %1217 = vmatpush3.bf16.msra.mxu1 %v1214_v40 }
 0x172   :  { %1219 = vmatprep.subr.bf16.mxu1 %v1218_v49  ;;  %1193 = vmatpush3.bf16.msra.mxu0 %v1192_v54 }
 0x173   :  { %1195 = vmatprep.subr.bf16.mxu0 %v1194_v55 }
 0x175   :  { %1221 = vmatpush3.bf16.msra.mxu1 %v1218_v49 }
 0x176   :  { %1223 = vmatprep.subr.bf16.mxu1 %v1222_v58  ;;  %1197 = vmatpush3.bf16.msra.mxu0 %v1196_v59 }
 0x179   :  { %1225 = vmatpush3.bf16.msra.mxu1 %v1222_v58 }
 0x17a   :  { %1227 = vmatprep.subr.bf16.mxu1 %v1226_v62 }
 0x17d   :  { %1229 = vmatpush3.bf16.msra.mxu1 %v1226_v62 }
 0x22c   :  { %v853_v63 = vpop.f32.mrb[4].mxu0 }
 0x22d   :  { %v854_v0 = vpop.f32.mrb[5].mxu0 }
 0x22e   :  { %v855_v1 = vadd.f32 %v854_v0, %v853_v63 }
 0x230   :  { %v856_v2 = vpop.f32.mrb[6].mxu0  ;;  %v435_v7 = vadd.f32 %v855_v1, %v761_v3 }
 0x231   :  { %v857_v4 = vpop.f32.mrb[7].mxu0 }
 0x232   :  { %v858_v5 = vadd.f32 %v857_v4, %v856_v2 }
 0x233   :  { %v1002_v6 = vpop.f32.mrb[2].mxu1 }
 0x234   :  { %v440_v8 = vadd.f32 %v858_v5, %v761_v3  ;;  %v509_v9 = vpop.f32.mrb[3].mxu1 }
 0x235   :  { %v510_v10 = vadd.f32 %v509_v9, %v435_v7 }
 0x236   :  { %v515_v11 = vadd.f32 %v1002_v6, %v440_v8 }
 0x237   :  { %1245 = vtanh.f32 %v510_v10 }
 0x238   :  { %1247 = vtanh.f32 %v515_v11 }
 0x241   :  { %v1246_v12 = vpop.eup %1245 }
 0x242   :  { %v1248_v13 = vpop.eup %1247  ;;  %v520_v14 = vmul.f32 2.0, %v1246_v12 }
 0x243   :  { %v521_v15 = vmul.f32 2.0, %v1248_v13 }
 0x244   :  { %v522_v16 = vmul.f32 %v1246_v12, %v520_v14 }
 0x245   :  { %v523_v17 = vmul.f32 %v1248_v13, %v521_v15 }
 0x246   :  { %v762_v18 = vadd.f32 -1.0, %v522_v16 }
 0x247   :  { %v763_v19 = vadd.f32 -1.0, %v523_v17 }
 0x248   :  { %649 = vmatprep.mubr.f32.mxu0 %v762_v18  ;;  %v526_v20 = vmul.f32 %v762_v18, %v520_v14 }
 0x249   :  { %650 = vmatmul.mubr.f32.vlgmr.msra.gmra.mrb[8].mxu0 %v1246_v12  ;;  %v527_v21 = vmul.f32 %v763_v19, %v521_v15 }
 0x24a   :  { %654 = vmatprep.mubr.f32.mxu0 %v763_v19  ;;  %v528_v22 = vsub.f32 %v526_v20, %v1246_v12 }
 0x24b   :  { %v529_v23 = vsub.f32 %v527_v21, %v1248_v13 }
 0x24c   :  { %1035 = vmatprep.mubr.f32.mxu1 %v528_v22 }
 0x24d   :  { %655 = vmatmul.mubr.f32.gmra.mrb[10].mxu0 %v1248_v13  ;;  %1036 = vmatmul.mubr.f32.vlgmr.msra.gmra.mrb[4].mxu1 %v529_v23 }
 0x31c   :  { %v909_v24 = vpop.f32.mrb[8].mxu0 }
 0x31d   :  { %v910_v25 = vpop.f32.mrb[9].mxu0 }
 0x31e   :  { %v911_v27 = vadd.f32 %v910_v25, %v909_v24 }
 0x320   :  { %v912_v28 = vpop.f32.mrb[10].mxu0  ;;  %v1037_v29 = vpop.f32.mrb[4].mxu1  ;;  %v652_v30 = vadd.f32 %v911_v27, %v764_v26 }
 0x321   :  { %v913_v31 = vpop.f32.mrb[11].mxu0  ;;  %v726_v32 = vpop.f32.mrb[5].mxu1 }
 0x322   :  { %v914_v33 = vadd.f32 %v913_v31, %v912_v28  ;;  %v727_v34 = vadd.f32 %v726_v32, %v652_v30 }
 0x324   :  { %v657_v35 = vadd.f32 %v914_v33, %v764_v26  ;;  %735 = vst [vmem:[#allocation10] sm:$0xff] %v727_v34 }
 0x326   :  { %v732_v36 = vadd.f32 %v1037_v29, %v657_v35 }
 0x328   :  { %736 = vst [vmem:[#allocation10 + $0x8] sm:$0xff] %v732_v36 }
 0x329   :  { %1348 = shalt.err (!%p1345_p8)
}
 0x32a   :  { %s1349_s11 = scalar_lea.hbm %s1519_s7, 256 }
 0x32b   :  { %p1350_p9 = scmp.ne.s32.totalorder %s1519_s7, %s1349_s11  ;;  %p1353_p10 = scmp.lt.u32.totalorder %s1349_s11, %s1519_s7 }
 0x32d   :  { %p1355_p11 = pnand %p1353_p10, %p1350_p9 }
 0x32f   :  { %1358 = shalt.err (!%p1355_p11)
}
 0x330   :  { %748 = dma.vmem_to_hbm [thread:$0]  %s743_s8, 256, %s1519_s7, [#allocation4], %s1369_s13, %s1369_s13, %s1370_s14  }
 0x331   :  { %1365 = dma.done.wait [#allocation4], 256  }
 0x332   :  { %1366 = vsyncadd [#allocation4], 4294967040 }
 0x333   :  { %752 = vsyncpa [#allocation3], 1 }
 0x334   :  { %753 = vsyncpa [#allocation6], 1 }
 0x335   :  { %754 = vsyncpa [#allocation9], 1 }
 0x336   :  { %755 = vsyncpa [#allocation4], 1 }

</bundles_post_ra>
